<compile_context>
chip_gen: v7x
topology: tpu7x:2x2x1
jax: 0.10.0
libtpu: 0.0.40
codegen_flags: <defaults>
</compile_context>

<pallas_src>
import jax
import jax.numpy as jnp
from jax.experimental import pallas as pl
from jax.experimental.pallas import tpu as pltpu

IN_DIM = 32        # feature dim of mol1 / mol2 fed to the synthetic encoder
LATENT = 128       # latent_dim
NUM_TASKS = 1
BATCH = 8


def ddi_kernel(mol1_ref, mol2_ref,          # [TB, IN_DIM] bf16
               we_ref, be_ref,              # [IN_DIM, L] bf16, [1, L] f32
               w1_ref, b1_ref,              # [2L, 2L] bf16, [1, 2L] f32
               w2t_ref, b2_ref,             # [1, 2L] bf16, SMEM (1,) f32
               out_ref):                    # [TB, NUM_TASKS] f32
    tb = mol1_ref.shape[0]

    # --- encoder(mol) = relu(mol @ We + be), fused for both molecules -------
    # Stack rows: one [2*TB, IN_DIM] @ [IN_DIM, L] MXU pass instead of two.
    mols = jnp.concatenate([mol1_ref[...], mol2_ref[...]], axis=0)
    emb = jnp.dot(mols, we_ref[...], preferred_element_type=jnp.float32)
    emb = jnp.maximum(emb + be_ref[...], 0.0)                    # [2*TB, L] f32

    # --- predictor layer 1: Linear(2L, 2L) on cat(emb1, emb2), then ReLU ----
    # cat along the feature axis, built in-kernel; single K=2L matmul.
    emb_cat = jnp.concatenate([emb[:tb], emb[tb:]], axis=-1)     # [TB, 2L] f32
    h = jnp.dot(emb_cat.astype(w1_ref.dtype), w1_ref[...],
                preferred_element_type=jnp.float32)
    h = jnp.maximum(h + b1_ref[...], 0.0)                        # [TB, 2L] f32

    # Dropout: eval-mode identity (inference semantics).

    # --- predictor layer 2: Linear(2L, NUM_TASKS=1) on the VPU + lane reduce
    # [TB,2L]@[2L,1] wastes the MXU (N=1); multiply-broadcast + sum instead.
    w2_row = w2t_ref[...].astype(jnp.float32)                    # [1, 2L]
    out = jnp.sum(h * w2_row, axis=-1, keepdims=True) + b2_ref[0]
    out_ref[...] = out.astype(out_ref.dtype)


def ddi_predictor(mol1, mol2, params):
    B = mol1.shape[0]
    TB = B if B <= 256 else 256            # batch tile (multiple of 8 assumed)
    nb = pl.cdiv(B, TB)

    # Cast weights / activations to bf16 once at the call boundary.
    mol1_b = mol1.astype(jnp.bfloat16)
    mol2_b = mol2.astype(jnp.bfloat16)
    we = params["we"].astype(jnp.bfloat16)
    w1 = params["w1"].astype(jnp.bfloat16)
    w2t = params["w2"].T.astype(jnp.bfloat16)          # [1, 2L] for VPU broadcast
    be = params["be"].astype(jnp.float32)
    b1 = params["b1"].astype(jnp.float32)
    b2 = params["b2"].reshape((NUM_TASKS,)).astype(jnp.float32)  # SMEM scalar

    resident = lambda shape: pl.BlockSpec(shape, lambda i: (0,) * len(shape))

    return pl.pallas_call(
        ddi_kernel,
        out_shape=jax.ShapeDtypeStruct((B, NUM_TASKS), jnp.float32),
        grid=(nb,),
        in_specs=[
            pl.BlockSpec((TB, IN_DIM), lambda i: (i, 0)),    # mol1 tile
            pl.BlockSpec((TB, IN_DIM), lambda i: (i, 0)),    # mol2 tile
            resident((IN_DIM, LATENT)),                      # encoder weight
            resident((1, LATENT)),                           # encoder bias
            resident((2 * LATENT, 2 * LATENT)),              # W1 (whole)
            resident((1, 2 * LATENT)),                       # b1
            resident((1, 2 * LATENT)),                       # W2^T
            pl.BlockSpec(memory_space=pltpu.MemorySpace.SMEM),  # b2 scalar
        ],
        out_specs=pl.BlockSpec((TB, NUM_TASKS), lambda i: (i, 0)),
        compiler_params=pltpu.CompilerParams(
            dimension_semantics=("parallel",)),
    )(mol1_b, mol2_b, we, be, w1, b1, w2t, b2)


def init_params(key):
    ks = jax.random.split(key, 6)
    scale = 0.05
    return {
        "we": scale * jax.random.normal(ks[0], (IN_DIM, LATENT), jnp.float32),
        "be": scale * jax.random.normal(ks[1], (1, LATENT), jnp.float32),
        "w1": scale * jax.random.normal(ks[2], (2 * LATENT, 2 * LATENT), jnp.float32),
        "b1": scale * jax.random.normal(ks[3], (1, 2 * LATENT), jnp.float32),
        "w2": scale * jax.random.normal(ks[4], (2 * LATENT, NUM_TASKS), jnp.float32),
        "b2": scale * jax.random.normal(ks[5], (1, NUM_TASKS), jnp.float32),
    }


def reference_bf16(mol1, mol2, p):
    """Reference using the same bf16 weight cast + f32 accumulation."""
    we = p["we"].astype(jnp.bfloat16)
    w1 = p["w1"].astype(jnp.bfloat16)
    w2 = p["w2"].astype(jnp.bfloat16)
    m1 = mol1.astype(jnp.bfloat16)
    m2 = mol2.astype(jnp.bfloat16)
    emb1 = jnp.maximum(jnp.dot(m1, we, preferred_element_type=jnp.float32)
                       + p["be"], 0.0)
    emb2 = jnp.maximum(jnp.dot(m2, we, preferred_element_type=jnp.float32)
                       + p["be"], 0.0)
    emb = jnp.concatenate([emb1, emb2], axis=-1)
    h = jnp.maximum(jnp.dot(emb.astype(jnp.bfloat16), w1,
                            preferred_element_type=jnp.float32) + p["b1"], 0.0)
    return jnp.dot(h.astype(jnp.bfloat16), w2,
                   preferred_element_type=jnp.float32) + p["b2"]


def reference_f32(mol1, mol2, p):
    emb1 = jnp.maximum(mol1 @ p["we"] + p["be"], 0.0)
    emb2 = jnp.maximum(mol2 @ p["we"] + p["be"], 0.0)
    emb = jnp.concatenate([emb1, emb2], axis=-1)
    h = jnp.maximum(emb @ p["w1"] + p["b1"], 0.0)
    return h @ p["w2"] + p["b2"]


if __name__ == "__main__":
    # TODO(synk): the real `encoder` is a user-supplied pretrained module;
    # a deterministic Linear+ReLU stand-in is used here.
    key = jax.random.PRNGKey(0)
    kp, k1, k2 = jax.random.split(key, 3)
    params = init_params(kp)
    mol1 = jax.random.normal(k1, (BATCH, IN_DIM), jnp.float32)
    mol2 = jax.random.normal(k2, (BATCH, IN_DIM), jnp.float32)

    out = ddi_predictor(mol1, mol2, params)
    jax.block_until_ready(out)

    assert out.shape == (BATCH, NUM_TASKS)
    ref_b = reference_bf16(mol1, mol2, params)
    ref_f = reference_f32(mol1, mol2, params)
    assert jnp.allclose(out, ref_b, atol=2e-3, rtol=2e-3), \
        f"mismatch vs bf16 reference: {jnp.max(jnp.abs(out - ref_b))}"
    assert jnp.allclose(out, ref_f, atol=2e-2, rtol=2e-2), \
        f"mismatch vs f32 reference: {jnp.max(jnp.abs(out - ref_f))}"
    print("KERNEL_OK")
</pallas_src>

<mosaic_0001>
module attributes {stable_mosaic.version = 11 : i64} {
  func.func @ddi_kernel(%arg0: i32, %arg1: memref<8x32xbf16, #tpu.memory_space<vmem>>, %arg2: memref<8x32xbf16, #tpu.memory_space<vmem>>, %arg3: memref<32x128xbf16, #tpu.memory_space<vmem>>, %arg4: memref<1x128xf32, #tpu.memory_space<vmem>>, %arg5: memref<256x256xbf16, #tpu.memory_space<vmem>>, %arg6: memref<1x256xf32, #tpu.memory_space<vmem>>, %arg7: memref<1x256xbf16, #tpu.memory_space<vmem>>, %arg8: memref<1xf32, #tpu.memory_space<smem>>, %arg9: memref<8x1xf32, #tpu.memory_space<vmem>>) attributes {dimension_semantics = [#tpu.dimension_semantics<parallel>], iteration_bounds = array<i64: 1>, scalar_prefetch = 0 : i64, scratch_operands = 0 : i64, tpu.core_type = #tpu.core_type<tc>, window_params = [{transform_indices = @transform_0, window_bounds = array<i64: 8, 32>}, {transform_indices = @transform_1, window_bounds = array<i64: 8, 32>}, {pipeline_mode = #tpu.pipeline_mode<synchronous>, transform_indices = @transform_2, window_bounds = array<i64: 32, 128>}, {pipeline_mode = #tpu.pipeline_mode<synchronous>, transform_indices = @transform_3, window_bounds = array<i64: 1, 128>}, {pipeline_mode = #tpu.pipeline_mode<synchronous>, transform_indices = @transform_4, window_bounds = array<i64: 256, 256>}, {pipeline_mode = #tpu.pipeline_mode<synchronous>, transform_indices = @transform_5, window_bounds = array<i64: 1, 256>}, {pipeline_mode = #tpu.pipeline_mode<synchronous>, transform_indices = @transform_6, window_bounds = array<i64: 1, 256>}, {transform_indices = @transform_7, window_bounds = array<i64: 1>}, {transform_indices = @transform_8, window_bounds = array<i64: 8, 1>}]} {
    %c0 = arith.constant 0 : index
    %c0_0 = arith.constant 0 : index
    %0 = vector.load %arg1[%c0, %c0_0] : memref<8x32xbf16, #tpu.memory_space<vmem>>, vector<8x32xbf16>
    %c0_1 = arith.constant 0 : index
    %c0_2 = arith.constant 0 : index
    %1 = vector.load %arg2[%c0_1, %c0_2] : memref<8x32xbf16, #tpu.memory_space<vmem>>, vector<8x32xbf16>
    %2 = tpu.concatenate %0, %1 in 0 : vector<8x32xbf16>, vector<8x32xbf16> -> vector<16x32xbf16>
    %c0_3 = arith.constant 0 : index
    %c0_4 = arith.constant 0 : index
    %3 = vector.load %arg3[%c0_3, %c0_4] : memref<32x128xbf16, #tpu.memory_space<vmem>>, vector<32x128xbf16>
    %cst = arith.constant dense<0.000000e+00> : vector<16x128xf32>
    %4 = tpu.matmul %2, %3, %cst {dimension_numbers = #tpu.dot_dimension_numbers<[1], [0], [0], [1], [0, 0, 1, 1], [], []>} : vector<16x32xbf16>, vector<32x128xbf16>, vector<16x128xf32> -> vector<16x128xf32>
    %c0_5 = arith.constant 0 : index
    %c0_6 = arith.constant 0 : index
    %5 = vector.load %arg4[%c0_5, %c0_6] : memref<1x128xf32, #tpu.memory_space<vmem>>, vector<1x128xf32>
    %6 = vector.broadcast %5 : vector<1x128xf32> to vector<16x128xf32>
    %7 = arith.addf %4, %6 : vector<16x128xf32>
    %cst_7 = arith.constant 0.000000e+00 : f32
    %8 = vector.broadcast %cst_7 : f32 to vector<16x128xf32>
    %9 = arith.maximumf %7, %8 : vector<16x128xf32>
    %10 = vector.extract_strided_slice %9 {offsets = [0, 0], sizes = [8, 128], strides = [1, 1]} : vector<16x128xf32> to vector<8x128xf32>
    %11 = vector.extract_strided_slice %9 {offsets = [8, 0], sizes = [8, 128], strides = [1, 1]} : vector<16x128xf32> to vector<8x128xf32>
    %12 = tpu.concatenate %10, %11 in 1 : vector<8x128xf32>, vector<8x128xf32> -> vector<8x256xf32>
    %13 = arith.truncf %12 : vector<8x256xf32> to vector<8x256xbf16>
    %c0_8 = arith.constant 0 : index
    %c0_9 = arith.constant 0 : index
    %14 = vector.load %arg5[%c0_8, %c0_9] : memref<256x256xbf16, #tpu.memory_space<vmem>>, vector<256x256xbf16>
    %cst_10 = arith.constant dense<0.000000e+00> : vector<8x256xf32>
    %15 = tpu.matmul %13, %14, %cst_10 {dimension_numbers = #tpu.dot_dimension_numbers<[1], [0], [0], [1], [0, 0, 1, 1], [], []>} : vector<8x256xbf16>, vector<256x256xbf16>, vector<8x256xf32> -> vector<8x256xf32>
    %c0_11 = arith.constant 0 : index
    %c0_12 = arith.constant 0 : index
    %16 = vector.load %arg6[%c0_11, %c0_12] : memref<1x256xf32, #tpu.memory_space<vmem>>, vector<1x256xf32>
    %17 = vector.broadcast %16 : vector<1x256xf32> to vector<8x256xf32>
    %18 = arith.addf %15, %17 : vector<8x256xf32>
    %cst_13 = arith.constant 0.000000e+00 : f32
    %19 = vector.broadcast %cst_13 : f32 to vector<8x256xf32>
    %20 = arith.maximumf %18, %19 : vector<8x256xf32>
    %c0_14 = arith.constant 0 : index
    %c0_15 = arith.constant 0 : index
    %21 = vector.load %arg7[%c0_14, %c0_15] : memref<1x256xbf16, #tpu.memory_space<vmem>>, vector<1x256xbf16>
    %22 = arith.extf %21 : vector<1x256xbf16> to vector<1x256xf32>
    %23 = vector.broadcast %22 : vector<1x256xf32> to vector<8x256xf32>
    %24 = arith.mulf %20, %23 : vector<8x256xf32>
    %cst_16 = arith.constant dense<0.000000e+00> : vector<8xf32>
    %25 = vector.multi_reduction <add>, %24, %cst_16 [1] : vector<8x256xf32> to vector<8xf32>
    %26 = vector.shape_cast %25 : vector<8xf32> to vector<8x1xf32>
    %c0_17 = arith.constant 0 : index
    %27 = memref.load %arg8[%c0_17] : memref<1xf32, #tpu.memory_space<smem>>
    %28 = vector.broadcast %27 : f32 to vector<8x1xf32>
    %29 = arith.addf %26, %28 : vector<8x1xf32>
    %c0_18 = arith.constant 0 : index
    %c0_19 = arith.constant 0 : index
    %30 = vector.load %arg9[%c0_18, %c0_19] : memref<8x1xf32, #tpu.memory_space<vmem>>, vector<8x1xf32>
    tpu.vector_store %arg9[%c0_18, %c0_19], %29 {strides = array<i32>} : memref<8x1xf32, #tpu.memory_space<vmem>>, vector<8x1xf32>,
    return
  }
  func.func @transform_0(%arg0: i32) -> (i32, i32) {
    %c0_i32 = arith.constant 0 : i32
    %c0_i32_0 = arith.constant 0 : i32
    return %arg0, %c0_i32 : i32, i32
  }
  func.func @transform_1(%arg0: i32) -> (i32, i32) {
    %c0_i32 = arith.constant 0 : i32
    %c0_i32_0 = arith.constant 0 : i32
    return %arg0, %c0_i32 : i32, i32
  }
  func.func @transform_2(%arg0: i32) -> (i32, i32) {
    %c0_i32 = arith.constant 0 : i32
    %c0_i32_0 = arith.constant 0 : i32
    %c0_i32_1 = arith.constant 0 : i32
    return %c0_i32, %c0_i32_0 : i32, i32
  }
  func.func @transform_3(%arg0: i32) -> (i32, i32) {
    %c0_i32 = arith.constant 0 : i32
    %c0_i32_0 = arith.constant 0 : i32
    %c0_i32_1 = arith.constant 0 : i32
    return %c0_i32, %c0_i32_0 : i32, i32
  }
  func.func @transform_4(%arg0: i32) -> (i32, i32) {
    %c0_i32 = arith.constant 0 : i32
    %c0_i32_0 = arith.constant 0 : i32
    %c0_i32_1 = arith.constant 0 : i32
    return %c0_i32, %c0_i32_0 : i32, i32
  }
  func.func @transform_5(%arg0: i32) -> (i32, i32) {
    %c0_i32 = arith.constant 0 : i32
    %c0_i32_0 = arith.constant 0 : i32
    %c0_i32_1 = arith.constant 0 : i32
    return %c0_i32, %c0_i32_0 : i32, i32
  }
  func.func @transform_6(%arg0: i32) -> (i32, i32) {
    %c0_i32 = arith.constant 0 : i32
    %c0_i32_0 = arith.constant 0 : i32
    %c0_i32_1 = arith.constant 0 : i32
    return %c0_i32, %c0_i32_0 : i32, i32
  }
  func.func @transform_7(%arg0: i32) -> i32 {
    %c0_i32 = arith.constant 0 : i32
    %c0_i32_0 = arith.constant 0 : i32
    return %c0_i32 : i32
  }
  func.func @transform_8(%arg0: i32) -> (i32, i32) {
    %c0_i32 = arith.constant 0 : i32
    %c0_i32_0 = arith.constant 0 : i32
    return %arg0, %c0_i32 : i32, i32
  }
}

</mosaic_0001>

<bundles_post_ra>
// kernel: tpu_custom_call.1
= control target key start
LH: loop header
LB: loop body
LE: loop exit
PB: predicated region body
PF: predicated region fallthrough
CT: control target
= control target key end

     0   :  { %14 = vsyncpa [#allocation4], 0  ;;  %s720_s0 = inlined_call_operand.hbm [shape: bf16[8,32], index: 0, kind: input, shape index: {}]   ;;  %s721_s1 = inlined_call_operand.vmem [shape: bf16[8,32], index: 1, kind: input, shape index: {}]   ;;  %s722_s2 = inlined_call_operand.hbm [shape: bf16[32,128], index: 2, kind: input, shape index: {}]   ;;  %s723_s3 = inlined_call_operand.vmem [shape: f32[1,128], index: 3, kind: input, shape index: {}]   ;;  %s724_s4 = inlined_call_operand.hbm [shape: bf16[256,256], index: 4, kind: input, shape index: {}]   ;;  %s725_s5 = inlined_call_operand.vmem [shape: f32[1,256], index: 5, kind: input, shape index: {}]   ;;  %s726_s6 = inlined_call_operand.vmem [shape: bf16[1,256], index: 6, kind: input, shape index: {}]   ;;  %s727_s7 = inlined_call_operand.<no memory space> [shape: f32[1], index: 7, kind: input, shape index: {}]   ;;  %s728_s8 = inlined_call_operand.vmem [shape: f32[8,1], index: 8, kind: output, shape index: {}]  }
   0x1   :  { %15 = vsyncpa [#allocation6], 0  ;;  %s612_s27 = smov [#allocation5]   ;;  %s542_s9 = scalar_lea.hbm %s722_s2, 256 }
   0x2   :  { %s33_s28 = sshll.u32 %s612_s27, 4  ;;  %p543_p0 = scmp.ne.s32.totalorder %s722_s2, %s542_s9  ;;  %s34_s28 = int_to_ptr.vmem [resolvable:$true] %s33_s28 }
   0x3   :  { %p546_p1 = scmp.lt.u32.totalorder %s542_s9, %s722_s2 }
   0x5   :  { %p548_p2 = pnand %p546_p1, %p543_p0 }
   0x7   :  { %551 = shalt.err (!%p548_p2)
}
   0x8   :  { %s552_s14 = scalar_lea.vmem %s34_s28, 256  ;;  %p557_p4 = scmp.lt.s32.totalorder %s34_s28, %s34_s28 }
   0x9   :  { %p553_p3 = scmp.ne.s32.totalorder %s34_s28, %s552_s14  ;;  %p558_p5 = scmp.lt.s32.totalorder %s552_s14, %s552_s14 }
   0xb   :  { %p559_p6 = por %p558_p5, %p557_p4 }
   0xd   :  { %p560_p7 = pnand %p559_p6, %p553_p3 }
   0xf   :  { %563 = shalt.err (!%p560_p7)
}
  0x10   :  { %s613_s15 = smov 64   ;;  %s614_s16 = smov 4  }
  0x11   :  { %39 = dma.hbm_to_vmem [thread:$0]  %s722_s2, 256, %s34_s28, [#allocation6], %s613_s15, %s613_s15, %s614_s16  }
  0x12   :  { %s615_s19 = smov [#allocation3]   ;;  %s616_s21 = smov [#allocation7]  }
  0x13   :  { %s22_s20 = sshll.u32 %s615_s19, 4  ;;  %s47_s22 = sshll.u32 %s616_s21, 4  ;;  %s23_s20 = int_to_ptr.vmem [resolvable:$true] %s22_s20  ;;  %s48_s22 = int_to_ptr.vmem [resolvable:$true] %s47_s22 }
  0x14   :  { %s564_s25 = scalar_lea.hbm %s720_s0, 64 }
  0x15   :  { %p565_p8 = scmp.ne.s32.totalorder %s720_s0, %s564_s25  ;;  %p568_p9 = scmp.lt.u32.totalorder %s564_s25, %s720_s0 }
  0x17   :  { %p570_p10 = pnand %p568_p9, %p565_p8 }
  0x19   :  { %573 = shalt.err (!%p570_p10)
}
  0x1a   :  { %s574_s2 = scalar_lea.vmem %s23_s20, 64  ;;  %p579_p12 = scmp.lt.s32.totalorder %s23_s20, %s23_s20 }
  0x1b   :  { %p575_p11 = scmp.ne.s32.totalorder %s23_s20, %s574_s2  ;;  %p580_p13 = scmp.lt.s32.totalorder %s574_s2, %s574_s2 }
  0x1d   :  { %p581_p0 = por %p580_p13, %p579_p12 }
  0x1f   :  { %p582_p1 = pnand %p581_p0, %p575_p11 }
  0x21   :  { %585 = shalt.err (!%p582_p1)
}
  0x22   :  { %25 = dma.hbm_to_vmem [thread:$0]  %s720_s0, 64, %s23_s20, [#allocation4]  }
  0x23   :  { %s586_s12 = scalar_lea.hbm %s724_s4, 4096 }
  0x24   :  { %p587_p2 = scmp.ne.s32.totalorder %s724_s4, %s586_s12  ;;  %p590_p3 = scmp.lt.u32.totalorder %s586_s12, %s724_s4 }
  0x26   :  { %p592_p4 = pnand %p590_p3, %p587_p2 }
  0x28   :  { %595 = shalt.err (!%p592_p4)
}
  0x29   :  { %s596_s17 = scalar_lea.vmem %s48_s22, 4096  ;;  %p601_p6 = scmp.lt.s32.totalorder %s48_s22, %s48_s22 }
  0x2a   :  { %p597_p5 = scmp.ne.s32.totalorder %s48_s22, %s596_s17  ;;  %p602_p7 = scmp.lt.s32.totalorder %s596_s17, %s596_s17 }
  0x2c   :  { %p603_p8 = por %p602_p7, %p601_p6 }
  0x2e   :  { %p604_p9 = pnand %p603_p8, %p597_p5 }
  0x30   :  { %607 = shalt.err (!%p604_p9)
}
  0x31   :  { %s617_s0 = smov 128   ;;  %s618_s18 = smov 8  }
  0x32   :  { %53 = dma.hbm_to_vmem [thread:$0]  %s724_s4, 4096, %s48_s22, [#allocation6], %s617_s0, %s617_s0, %s618_s18  }
  0x33   :  { %608 = dma.done.wait [#allocation4], 64  }
  0x34   :  { %609 = vsyncadd [#allocation4], 4294967232 }
  0x35   :  { %610 = dma.done.wait [#allocation6], 4352  }
  0x36   :  { %611 = vsyncadd [#allocation6], 4294962944  ;;  %v619_v0 = vmov 0.0   ;;  %vm620_vm0 = vmmov 0   ;;  %v491_v1 = vld [vmem:[#allocation5] sm:$0xff]   ;;  %v492_v2 = vld [vmem:[#allocation5 + $0x8] sm:$0xff]   ;;  %v184_v49 = vlaneseq }
  0x37   :  { %474 = vmatprep.subr.bf16.mxu0 %v619_v0  ;;  %478 = vmatprep.mubr.msk.bf16.mxu0 %vm620_vm0, %v619_v0  ;;  %v70_v3 = vld [vmem:[#allocation3] sm:$0xf]  ;;  %vm75_vm1 = vcmask 1043456   ;;  %v496_v6 = vld [vmem:[#allocation7] ss:$8 sps:$4 sm:$0xff]   ;;  %vm102_vm2 = vcmask 261120  }
  0x38   :  { %475 = vmatpush3.bf16.msra.mxu0 %v491_v1  ;;  %v493_v4 = vld [vmem:[%s721_s1] ss:$0 sps:$4 sm:$0xff]   ;;  %v497_v7 = vld [vmem:[#allocation7 + $0x14] ss:$8 sps:$4 sm:$0xff]   ;;  %v499_v9 = vld [vmem:[#allocation7 + $0x10] ss:$8 sps:$4 sm:$0xff]  }
  0x39   :  { %476 = vmatprep.subr.bf16.mxu0 %v619_v0  ;;  %v494_v5 = vld [vmem:[#allocation7 + $0x4] ss:$8 sps:$4 sm:$0xff]   ;;  %v78_v8 = vsel %vm75_vm1, %v70_v3, %v493_v4  ;;  %v502_v11 = vld [vmem:[#allocation7 + $0x20] ss:$8 sps:$4 sm:$0xff]   ;;  %v503_v12 = vld [vmem:[#allocation7 + $0x34] ss:$8 sps:$4 sm:$0xff]  }
  0x3a   :  { %354 = vmatprep.subr.bf16.mxu1 %v494_v5  ;;  %v500_v10 = vld [vmem:[#allocation7 + $0x24] ss:$8 sps:$4 sm:$0xff]   ;;  %v505_v13 = vld [vmem:[#allocation7 + $0x30] ss:$8 sps:$4 sm:$0xff]   ;;  %v508_v15 = vld [vmem:[#allocation7 + $0x40] ss:$8 sps:$4 sm:$0xff]  }
  0x3b   :  { %355 = vmatpush1.bf16.msra.mxu1 %v496_v6  ;;  %v506_v14 = vld [vmem:[#allocation7 + $0x44] ss:$8 sps:$4 sm:$0xff]   ;;  %v509_v16 = vld [vmem:[#allocation7 + $0x54] ss:$8 sps:$4 sm:$0xff]   ;;  %v511_v17 = vld [vmem:[#allocation7 + $0x50] ss:$8 sps:$4 sm:$0xff]  }
  0x3c   :  { %477 = vmatpush3.bf16.msra.mxu0 %v492_v2  ;;  %356 = vmatprep.subr.bf16.mxu1 %v497_v7  ;;  %v512_v18 = vld [vmem:[#allocation7 + $0x64] ss:$8 sps:$4 sm:$0xff]   ;;  %v514_v19 = vld [vmem:[#allocation7 + $0x60] ss:$8 sps:$4 sm:$0xff]   ;;  %v515_v20 = vld [vmem:[#allocation7 + $0x74] ss:$8 sps:$4 sm:$0xff]  }
  0x3d   :  { %v517_v21 = vld [vmem:[#allocation7 + $0x70] ss:$8 sps:$4 sm:$0xff]   ;;  %v518_v22 = vld [vmem:[#allocation7 + $0x84] ss:$8 sps:$4 sm:$0xff]   ;;  %v520_v23 = vld [vmem:[#allocation7 + $0x80] ss:$8 sps:$4 sm:$0xff]  }
  0x3e   :  { %v521_v24 = vld [vmem:[#allocation7 + $0x94] ss:$8 sps:$4 sm:$0xff]   ;;  %v523_v25 = vld [vmem:[#allocation7 + $0x90] ss:$8 sps:$4 sm:$0xff]   ;;  %v524_v26 = vld [vmem:[#allocation7 + $0xa4] ss:$8 sps:$4 sm:$0xff]  }
  0x3f   :  { %479 = vmatmul.mubr.msk.bf16.vlgmr.msra.gmra.mrb[0].mxu0 %vm102_vm2, %v78_v8  ;;  %357 = vmatpush1.bf16.msra.mxu1 %v499_v9  ;;  %v526_v27 = vld [vmem:[#allocation7 + $0xa0] ss:$8 sps:$4 sm:$0xff]   ;;  %v527_v28 = vld [vmem:[#allocation7 + $0xb4] ss:$8 sps:$4 sm:$0xff]   ;;  %v529_v29 = vld [vmem:[#allocation7 + $0xb0] ss:$8 sps:$4 sm:$0xff]  }
  0x40   :  { %358 = vmatprep.subr.bf16.mxu1 %v500_v10  ;;  %v530_v30 = vld [vmem:[#allocation7 + $0xc4] ss:$8 sps:$4 sm:$0xff]   ;;  %v532_v31 = vld [vmem:[#allocation7 + $0xc0] ss:$8 sps:$4 sm:$0xff]   ;;  %v533_v32 = vld [vmem:[#allocation7 + $0xd4] ss:$8 sps:$4 sm:$0xff]   ;;  %v424_v10 = vstv %s727_s7 }
  0x41   :  { %v535_v33 = vld [vmem:[#allocation7 + $0xd0] ss:$8 sps:$4 sm:$0xff]   ;;  %v536_v34 = vld [vmem:[#allocation7 + $0xe4] ss:$8 sps:$4 sm:$0xff]   ;;  %v538_v35 = vld [vmem:[#allocation7 + $0xe0] ss:$8 sps:$4 sm:$0xff]  }
  0x42   :  { %v539_v36 = vld [vmem:[#allocation7 + $0xf4] ss:$8 sps:$4 sm:$0xff]   ;;  %v541_v37 = vld [vmem:[#allocation7 + $0xf0] ss:$8 sps:$4 sm:$0xff]   ;;  %v435_v38 = vld [vmem:[%s723_s3] ss:$0 sm:$0xff] }
  0x43   :  { %359 = vmatpush1.bf16.msra.mxu1 %v502_v11  ;;  %v185_v50 = vshrl.u32 %v184_v49, 7  ;;  %v397_v51 = vld [vmem:[%s726_s6] sm:$0x3]  ;;  %vm426_vm3 = vcmask 7168  }
  0x44   :  { %360 = vmatprep.subr.bf16.mxu1 %v503_v12  ;;  %v398_v53 = vunpack.c.l.bf16 %v397_v51  ;;  %v182_v54 = vld [vmem:[%s725_s5] sm:$0x3] }
  0x45   :  { %v186_v52 = vsub.s32 0, %v185_v50  ;;  %v190_v55 = vsub.s32 1, %v185_v50  ;;  %v406_v56 = vsub.s32 2, %v185_v50 }
  0x47   :  { %361 = vmatpush1.bf16.msra.mxu1 %v505_v13  ;;  %v187_v57 = vrot.slane %v182_v54, %v186_v52  ;;  %v403_v58 = vrot.slane %v398_v53, %v186_v52  ;;  %v191_v59 = vrot.slane %v182_v54, %v190_v55  ;;  %v407_v60 = vrot.slane %v398_v53, %v406_v56 }
  0x48   :  { %362 = vmatprep.subr.bf16.mxu1 %v506_v14 }
  0x49   :  { %v413_v0 = vrot.slane %v403_v58, %v186_v52  ;;  %v417_v3 = vrot.slane %v407_v60, %v186_v52 }
  0x4b   :  { %363 = vmatpush1.bf16.msra.mxu1 %v508_v15 }
  0x4c   :  { %364 = vmatprep.subr.bf16.mxu1 %v509_v16 }
  0x4f   :  { %365 = vmatpush1.bf16.msra.mxu1 %v511_v17 }
  0x50   :  { %366 = vmatprep.subr.bf16.mxu1 %v512_v18 }
  0x53   :  { %367 = vmatpush1.bf16.msra.mxu1 %v514_v19 }
  0x54   :  { %368 = vmatprep.subr.bf16.mxu1 %v515_v20 }
  0x57   :  { %369 = vmatpush1.bf16.msra.mxu1 %v517_v21 }
  0x58   :  { %370 = vmatprep.subr.bf16.mxu1 %v518_v22 }
  0x5b   :  { %371 = vmatpush1.bf16.msra.mxu1 %v520_v23 }
  0x5c   :  { %372 = vmatprep.subr.bf16.mxu1 %v521_v24 }
  0x5f   :  { %373 = vmatpush1.bf16.msra.mxu1 %v523_v25 }
  0x60   :  { %374 = vmatprep.subr.bf16.mxu1 %v524_v26 }
  0x63   :  { %375 = vmatpush1.bf16.msra.mxu1 %v526_v27 }
  0x64   :  { %376 = vmatprep.subr.bf16.mxu1 %v527_v28 }
  0x67   :  { %377 = vmatpush1.bf16.msra.mxu1 %v529_v29 }
  0x68   :  { %378 = vmatprep.subr.bf16.mxu1 %v530_v30 }
  0x6b   :  { %379 = vmatpush1.bf16.msra.mxu1 %v532_v31 }
  0x6c   :  { %380 = vmatprep.subr.bf16.mxu1 %v533_v32 }
  0x6f   :  { %381 = vmatpush1.bf16.msra.mxu1 %v535_v33 }
  0x70   :  { %382 = vmatprep.subr.bf16.mxu1 %v536_v34 }
  0x73   :  { %383 = vmatpush1.bf16.msra.mxu1 %v538_v35 }
  0x74   :  { %384 = vmatprep.subr.bf16.mxu1 %v539_v36 }
  0x77   :  { %385 = vmatpush1.bf16.msra.mxu1 %v541_v37 }
 0x112   :  { %v139_v39 = vpop.f32.mrb[0].mxu0 }
 0x113   :  { %v140_v40 = vadd.f32 %v435_v38, %v139_v39  ;;  %v480_v41 = vpop.f32.mrb[1].mxu0 }
 0x114   :  { %v142_v42 = vpop.f32.mrb[2].mxu0 }
 0x115   :  { %v143_v43 = vadd.f32 %v435_v38, %v142_v42  ;;  %v481_v44 = vpop.f32.mrb[3].mxu0  ;;  %v146_v45 = vmax.f32 %v140_v40, 0.0 }
 0x117   :  { %v147_v46 = vmax.f32 %v143_v43, 0.0  ;;  %v148_v48 = vpack.c.bf16 %v146_v45, %v146_v45 }
 0x119   :  { %v149_v47 = vpack.c.bf16 %v147_v46, %v147_v46 }
 0x11b   :  { %386 = vmatprep.mubr.bf16.mxu1 %v149_v47 }
 0x11c   :  { %387 = vmatmul.mubr.bf16.vlgmr.msra.gmra.mrb[0].mxu1 %v148_v48 }
 0x1ef   :  { %v388_v61 = vpop.f32.mrb[0].mxu1 }
 0x1f0   :  { %v389_v62 = vadd.f32 %v388_v61, %v187_v57  ;;  %v390_v63 = vpop.f32.mrb[1].mxu1 }
 0x1f1   :  { %v391_v1 = vadd.f32 %v390_v63, %v191_v59  ;;  %v392_v2 = vpop.f32.mrb[2].mxu1 }
 0x1f2   :  { %v395_v4 = vmax.f32 %v389_v62, 0.0  ;;  %v393_v5 = vpop.f32.mrb[3].mxu1 }
 0x1f3   :  { %v396_v6 = vmax.f32 %v391_v1, 0.0 }
 0x1f4   :  { %v418_v7 = vmul.f32 %v413_v0, %v395_v4 }
 0x1f5   :  { %v419_v8 = vmul.f32 %v417_v3, %v396_v6 }
 0x1f7   :  { %v420_v9 = vadd.f32 %v419_v8, %v418_v7 }
 0x1f9   :  { %421 = vadd.xlane.f32.xlu0 %v420_v9 }
 0x286   :  { %v422_v11 = vpop.xlane.xlu0 %421 }
 0x287   :  { %v425_v12 = vadd.f32 %v424_v10, %v422_v11 }
 0x289   :  { %427 = vst.msk [vmem:[%s728_s8] sm:$0xff] %vm426_vm3, %v425_v12 }
 0x28a   :  { %432 = vsyncpa [#allocation4], 1 }
 0x28b   :  { %433 = vsyncpa [#allocation6], 1 }

</bundles_post_ra>
